<compile_context>
chip_gen: v7x
topology: tpu7x:2x2x1
jax: 0.10.0
libtpu: 0.0.40
codegen_flags: <defaults>
</compile_context>

<pallas_src>
import math
from functools import partial

import numpy as np
import jax
import jax.numpy as jnp
from jax.experimental import pallas as pl
from jax.experimental.pallas import tpu as pltpu


def _round_up(a, b):
    return (a + b - 1) // b * b


def _fourier_kernel(x_ref, fpat_ref, cmask_ref, o_ref, *, sub, subs_per_step, k, c):
    # x_ref:     (subs_per_step*sub, k)    folded inputs: row r holds x[r*k : r*k+k]
    # fpat_ref:  (1, k*c) f32              per-lane frequency pattern (2*pi*f, [f|f] per group)
    # cmask_ref: (1, k*c) f32              1.0 on cos columns, 0.0 on sin columns
    # o_ref:     (subs_per_step*sub, k*c)  folded output (lane-dense when k*c % 128 == 0)
    fpat = fpat_ref[...]                       # (1, k*c), f32
    is_cos = cmask_ref[...] > 0.5              # (1, k*c), bool

    @pl.loop(0, subs_per_step)
    def _(s):
        row0 = pl.multiple_of(s * sub, sub)
        xs = x_ref[pl.ds(row0, sub), :].astype(jnp.float32)        # (sub, k), f32 phase math
        # Expand each of the k folded values across its c output lanes and
        # assemble one lane-dense (sub, k*c) tile (single concat, no reshape).
        cols = [jnp.broadcast_to(xs[:, j:j + 1], (sub, c)) for j in range(k)]
        xe = jnp.concatenate(cols, axis=-1)                         # (sub, k*c)
        phase = xe * fpat                                           # f32, full 128-lane vregs
        out = jnp.where(is_cos, jnp.cos(phase), jnp.sin(phase))     # EUP work, lane-dense
        o_ref[pl.ds(row0, sub), :] = out.astype(o_ref.dtype)        # one unmasked store / chunk


def fourier_embedding(x, freqs, *, out_dtype=None):
    """Pallas TPU FourierEmbedding forward.

    x:     (N,) float array (noise levels)
    freqs: (C/2,) float array (the module's `freqs` buffer)
    Returns (N, C) = concat([cos(outer(x, 2*pi*freqs)), sin(...)], axis=1).
    """
    if x.ndim != 1:
        raise ValueError("x must be 1-D (torch .ger() semantics)")
    n = x.shape[0]
    half = freqs.shape[0]
    c = 2 * half
    out_dtype = jnp.dtype(out_dtype if out_dtype is not None else x.dtype)

    # Match torch: 2*pi*freqs cast to x.dtype first; trig is then done in f32.
    f_scaled = (2.0 * np.pi * freqs).astype(x.dtype).astype(jnp.float32)   # (half,)

    # Fold factor: smallest k with (k*c) % 128 == 0 (capped for pathological C;
    # correctness never depends on k, only lane density does).
    k = min(128 // math.gcd(c, 128), 16)

    # Tiling: SUB folded rows per in-kernel compute chunk (keeps live vregs
    # modest); up to MAX_SUBS chunks per grid step to amortize per-step
    # overhead while keeping double-buffered VMEM use small on all chips.
    rows_needed = pl.cdiv(n, k)
    SUB = min(64, _round_up(rows_needed, 8))
    MAX_SUBS = 64
    n_sub = pl.cdiv(rows_needed, SUB)
    n_steps = pl.cdiv(n_sub, MAX_SUBS)
    subs_per_step = pl.cdiv(n_sub, n_steps)
    chunk_rows = subs_per_step * SUB
    r_pad = n_steps * chunk_rows
    n_pad = r_pad * k

    # Pad + fold x: row r of x2d holds original elements [r*k, r*k + k).
    x2d = jnp.pad(x, (0, n_pad - n)).reshape(r_pad, k)

    # Tiny per-lane patterns built once on the host/XLA side.
    base_f = jnp.concatenate([f_scaled, f_scaled])                       # (c,)
    f_pat = jnp.tile(base_f, k).reshape(1, k * c)
    base_m = jnp.concatenate([jnp.ones((half,), jnp.float32),
                              jnp.zeros((half,), jnp.float32)])          # cos | sin
    cmask = jnp.tile(base_m, k).reshape(1, k * c)

    kernel = partial(_fourier_kernel, sub=SUB, subs_per_step=subs_per_step, k=k, c=c)

    cost = pl.CostEstimate(
        flops=2 * n_pad * c,                 # mul + select per output element
        transcendentals=2 * n_pad * c,       # cos + sin evaluated per element
        bytes_accessed=(n_pad * x.dtype.itemsize
                        + n_pad * c * out_dtype.itemsize
                        + 2 * k * c * 4),
    )

    out_folded = pl.pallas_call(
        kernel,
        out_shape=jax.ShapeDtypeStruct((r_pad, k * c), out_dtype),
        grid=(n_steps,),
        in_specs=[
            pl.BlockSpec((chunk_rows, k), lambda i: (i, 0)),
            pl.BlockSpec((1, k * c), lambda i: (0, 0)),
            pl.BlockSpec((1, k * c), lambda i: (0, 0)),
        ],
        out_specs=pl.BlockSpec((chunk_rows, k * c), lambda i: (i, 0)),
        compiler_params=pltpu.CompilerParams(dimension_semantics=("parallel",)),
        cost_estimate=cost,
    )(x2d, f_pat, cmask)

    # (r_pad, k*c) is row-major identical to (n_pad, c): reshape is free.
    return out_folded.reshape(n_pad, c)[:n]


if __name__ == "__main__":
    num_channels = 32
    scale = 16.0
    N = 8

    key = jax.random.PRNGKey(0)
    k_freq, k_x = jax.random.split(key)

    # Deterministic stand-in for the torch.randn(num_channels//2) * scale buffer.
    freqs = jax.random.normal(k_freq, (num_channels // 2,), dtype=jnp.float32) * scale
    # Example input: 1-D vector of noise levels, as the .ger() call implies.
    x = jax.random.normal(k_x, (N,), dtype=jnp.float32)

    out = fourier_embedding(x, freqs)
    out = jax.block_until_ready(out)

    # Reference check in plain JAX (same math as the PyTorch forward).
    phase = jnp.outer(x, (2.0 * np.pi * freqs).astype(x.dtype))
    ref = jnp.concatenate([jnp.cos(phase), jnp.sin(phase)], axis=1)
    assert out.shape == (N, num_channels)
    np.testing.assert_allclose(np.asarray(out), np.asarray(ref), rtol=1e-5, atol=1e-5)

    print("KERNEL_OK")
</pallas_src>

<mosaic_0001>
module attributes {stable_mosaic.version = 11 : i64} {
  func.func @_fourier_kernel(%arg0: i32, %arg1: memref<8x4xf32, #tpu.memory_space<vmem>>, %arg2: memref<1x128xf32, #tpu.memory_space<vmem>>, %arg3: memref<1x128xf32, #tpu.memory_space<vmem>>, %arg4: memref<8x128xf32, #tpu.memory_space<vmem>>) attributes {dimension_semantics = [#tpu.dimension_semantics<parallel>], iteration_bounds = array<i64: 1>, scalar_prefetch = 0 : i64, scratch_operands = 0 : i64, tpu.core_type = #tpu.core_type<tc>, window_params = [{transform_indices = @transform_0, window_bounds = array<i64: 8, 4>}, {pipeline_mode = #tpu.pipeline_mode<synchronous>, transform_indices = @transform_1, window_bounds = array<i64: 1, 128>}, {pipeline_mode = #tpu.pipeline_mode<synchronous>, transform_indices = @transform_2, window_bounds = array<i64: 1, 128>}, {transform_indices = @transform_3, window_bounds = array<i64: 8, 128>}]} {
    %c0 = arith.constant 0 : index
    %c0_0 = arith.constant 0 : index
    %0 = vector.load %arg2[%c0, %c0_0] : memref<1x128xf32, #tpu.memory_space<vmem>>, vector<1x128xf32>
    %c0_1 = arith.constant 0 : index
    %c0_2 = arith.constant 0 : index
    %1 = vector.load %arg3[%c0_1, %c0_2] : memref<1x128xf32, #tpu.memory_space<vmem>>, vector<1x128xf32>
    %cst = arith.constant 5.000000e-01 : f32
    %2 = vector.broadcast %cst : f32 to vector<1x128xf32>
    %3 = arith.cmpf ogt, %1, %2 : vector<1x128xf32>
    %c0_i32 = arith.constant 0 : i32
    %c1_i32 = arith.constant 1 : i32
    %4 = arith.muli %c0_i32, %c1_i32 : i32
    %c0_i32_3 = arith.constant 0 : i32
    %5 = arith.addi %c0_i32_3, %4 : i32
    %c8_i32 = arith.constant 8 : i32
    %6 = arith.muli %5, %c8_i32 : i32
    %7 = tpu.assume_multiple %6, 8 : i32
    %8 = arith.index_cast %7 : i32 to index
    %c0_4 = arith.constant 0 : index
    %9 = vector.load %arg1[%8, %c0_4] : memref<8x4xf32, #tpu.memory_space<vmem>>, vector<8x4xf32>
    %10 = vector.extract_strided_slice %9 {offsets = [0, 0], sizes = [8, 1], strides = [1, 1]} : vector<8x4xf32> to vector<8x1xf32>
    %11 = vector.shape_cast %10 : vector<8x1xf32> to vector<8x1xf32>
    %12 = vector.broadcast %11 : vector<8x1xf32> to vector<8x32xf32>
    %13 = vector.extract_strided_slice %9 {offsets = [0, 1], sizes = [8, 1], strides = [1, 1]} : vector<8x4xf32> to vector<8x1xf32>
    %14 = vector.shape_cast %13 : vector<8x1xf32> to vector<8x1xf32>
    %15 = vector.broadcast %14 : vector<8x1xf32> to vector<8x32xf32>
    %16 = vector.extract_strided_slice %9 {offsets = [0, 2], sizes = [8, 1], strides = [1, 1]} : vector<8x4xf32> to vector<8x1xf32>
    %17 = vector.shape_cast %16 : vector<8x1xf32> to vector<8x1xf32>
    %18 = vector.broadcast %17 : vector<8x1xf32> to vector<8x32xf32>
    %19 = vector.extract_strided_slice %9 {offsets = [0, 3], sizes = [8, 1], strides = [1, 1]} : vector<8x4xf32> to vector<8x1xf32>
    %20 = vector.shape_cast %19 : vector<8x1xf32> to vector<8x1xf32>
    %21 = vector.broadcast %20 : vector<8x1xf32> to vector<8x32xf32>
    %22 = tpu.concatenate %12, %15, %18, %21 in 1 : vector<8x32xf32>, vector<8x32xf32>, vector<8x32xf32>, vector<8x32xf32> -> vector<8x128xf32>
    %23 = vector.broadcast %0 : vector<1x128xf32> to vector<8x128xf32>
    %24 = arith.mulf %22, %23 : vector<8x128xf32>
    %25 = math.cos %24 : vector<8x128xf32>
    %26 = math.sin %24 : vector<8x128xf32>
    %27 = vector.shape_cast %3 : vector<1x128xi1> to vector<1x128xi1>
    %28 = vector.broadcast %27 : vector<1x128xi1> to vector<8x128xi1>
    %29 = arith.select %28, %25, %26 : vector<8x128xi1>, vector<8x128xf32>
    %30 = arith.index_cast %7 : i32 to index
    %c0_5 = arith.constant 0 : index
    %31 = vector.load %arg4[%30, %c0_5] : memref<8x128xf32, #tpu.memory_space<vmem>>, vector<8x128xf32>
    tpu.vector_store %arg4[%30, %c0_5], %29 {strides = array<i32>} : memref<8x128xf32, #tpu.memory_space<vmem>>, vector<8x128xf32>,
    %c1_i32_6 = arith.constant 1 : i32
    return
  }
  func.func @transform_0(%arg0: i32) -> (i32, i32) {
    %c0_i32 = arith.constant 0 : i32
    %c0_i32_0 = arith.constant 0 : i32
    return %arg0, %c0_i32 : i32, i32
  }
  func.func @transform_1(%arg0: i32) -> (i32, i32) {
    %c0_i32 = arith.constant 0 : i32
    %c0_i32_0 = arith.constant 0 : i32
    %c0_i32_1 = arith.constant 0 : i32
    return %c0_i32, %c0_i32_0 : i32, i32
  }
  func.func @transform_2(%arg0: i32) -> (i32, i32) {
    %c0_i32 = arith.constant 0 : i32
    %c0_i32_0 = arith.constant 0 : i32
    %c0_i32_1 = arith.constant 0 : i32
    return %c0_i32, %c0_i32_0 : i32, i32
  }
  func.func @transform_3(%arg0: i32) -> (i32, i32) {
    %c0_i32 = arith.constant 0 : i32
    %c0_i32_0 = arith.constant 0 : i32
    return %arg0, %c0_i32 : i32, i32
  }
}

</mosaic_0001>

<bundles_post_ra>
// kernel: tpu_custom_call.1
= control target key start
LH: loop header
LB: loop body
LE: loop exit
PB: predicated region body
PF: predicated region fallthrough
CT: control target
= control target key end

     0   :  { %v335_v1 = vmov 0   ;;  %v336_v2 = vmov 2   ;;  %s411_s0 = inlined_call_operand.vmem [shape: f32[8,4], index: 0, kind: input, shape index: {}]   ;;  %s412_s1 = inlined_call_operand.vmem [shape: f32[1,128], index: 1, kind: input, shape index: {}]   ;;  %s413_s2 = inlined_call_operand.vmem [shape: f32[1,128], index: 2, kind: input, shape index: {}]   ;;  %s414_s3 = inlined_call_operand.hbm [shape: f32[8,128], index: 3, kind: output, shape index: {}]  }
   0x1   :  { %v18_v0 = vld [vmem:[%s411_s0] sm:$0xff]  ;;  %302 = vset.pattern.permute.xlu0 %v335_v1  ;;  %304 = vset.pattern.permute.xlu1 %v336_v2 }
   0x2   :  { %8 = vsyncpa [#allocation3], 0  ;;  %21 = vperm.xlu0 %302, %v18_v0   ;;  %29 = vperm.xlu1 %304, %v18_v0   ;;  %v337_v3 = vmov 1   ;;  %v338_v4 = vmov 3   ;;  %vm36_vm0 = vcmask 261120   ;;  %vm38_vm1 = vcmask 523264  }
   0x3   :  { %vm40_vm2 = vcmask 785408   ;;  %v278_v10 = vld [vmem:[%s412_s1] ss:$0 sm:$0xff]  ;;  %v339_v24 = vmov 683565275  }
   0x4   :  { %v340_v26 = vmov 2475754826   ;;  %v341_v29 = vmov 2131351028   ;;  %v342_v32 = vmov 2102212464  }
   0x5   :  { %v343_v35 = vmov 920167782   ;;  %v344_v38 = vmov 1326507024  }
   0x6   :  { %303 = vset.pattern.permute.xlu0 %v337_v3  ;;  %305 = vset.pattern.permute.xlu1 %v338_v4 }
   0x7   :  { %25 = vperm.xlu0 %303, %v18_v0   ;;  %33 = vperm.xlu1 %305, %v18_v0  }
   0xb   :  { %306 = vset.pattern.permute.xlu0 %v338_v4 }
  0x81   :  { %v22_v5 = vpop.permute.xlu0 %21  ;;  %v30_v6 = vpop.permute.xlu1 %29 }
  0x86   :  { %v26_v7 = vpop.permute.xlu0 %25  ;;  %v34_v8 = vpop.permute.xlu1 %33 }
  0x87   :  { %v37_v9 = vsel %vm36_vm0, %v22_v5, %v26_v7 }
  0x88   :  { %v39_v11 = vsel %vm38_vm1, %v37_v9, %v30_v6 }
  0x89   :  { %v41_v12 = vsel %vm40_vm2, %v39_v11, %v34_v8 }
  0x8a   :  { %v373_v13 = vmul.f32 %v278_v10, %v41_v12 }
  0x8c   :  { %v52_v14 = vand.u32 2139095040, %v373_v13  ;;  %v49_v18 = vand.u32 2147483647, %v373_v13  ;;  %vm51_vm10 = vcmp.lt.s32.totalorder %v373_v13, 0 }
  0x8e   :  { %v53_v15 = vshrl.u32 %v52_v14, 23  ;;  %v56_v21 = vand.u32 8388607, %v49_v18  ;;  %vm50_vm11 = vcmp.le.f32.partialorder %v49_v18, 0.7853982 }
  0x90   :  { %v279_v16 = vadd.s32 4294967169, %v53_v15  ;;  %v57_v40 = vor.u32 8388608, %v56_v21 }
  0x92   :  { %v59_v17 = vadd.s32 1, %v279_v16  ;;  %v97_v54 = vshll.u32 %v57_v40, 8 }
  0x94   :  { %vm60_vm3 = vcmp.gt.s32.totalorder %v59_v17, 0 }
  0x95   :  { %v61_v19 = vsel %vm60_vm3, %v59_v17, 0 }
  0x96   :  { %v63_v20 = vand.u32 31, %v61_v19  ;;  %v62_v23 = vshrl.u32 %v61_v19, 5 }
  0x98   :  { %v64_v22 = vsub.s32 32, %v63_v20  ;;  %v66_v25 = vshll.u32 %v339_v24, %v63_v20  ;;  %v69_v27 = vshll.u32 %v340_v26, %v63_v20  ;;  %v72_v31 = vshll.u32 %v341_v29, %v63_v20 }
  0x99   :  { %v75_v34 = vshll.u32 %v342_v32, %v63_v20  ;;  %v78_v37 = vshll.u32 %v343_v35, %v63_v20  ;;  %vm81_vm4 = vcmp.lt.s32.totalorder %v62_v23, 1  ;;  %vm84_vm5 = vcmp.lt.s32.totalorder %v62_v23, 4 }
  0x9a   :  { %v67_v28 = vshrl.u32 %v340_v26, %v64_v22  ;;  %v70_v30 = vshrl.u32 %v341_v29, %v64_v22  ;;  %v73_v33 = vshrl.u32 %v342_v32, %v64_v22  ;;  %v76_v36 = vshrl.u32 %v343_v35, %v64_v22 }
  0x9b   :  { %v79_v39 = vshrl.u32 %v344_v38, %v64_v22  ;;  %v65_v49 = vshrl.u32 %v339_v24, %v64_v22  ;;  %vm83_vm6 = vcmp.lt.s32.totalorder %v62_v23, 3  ;;  %vm82_vm7 = vcmp.lt.s32.totalorder %v62_v23, 2 }
  0x9c   :  { %v68_v41 = vor.u32 %v67_v28, %v66_v25  ;;  %v71_v42 = vor.u32 %v70_v30, %v69_v27  ;;  %v74_v43 = vor.u32 %v73_v33, %v72_v31  ;;  %v77_v44 = vor.u32 %v76_v36, %v75_v34  ;;  %v16_v33 = vld [vmem:[%s413_s2] sm:$0x1]  ;;  %s345_s2 = smov [#allocation2]  }
  0x9d   :  { %v80_v45 = vor.u32 %v79_v39, %v78_v37  ;;  %v257_v29 = vlaneseq  ;;  %vm17_vm12 = vcmp.gt.f32.partialorder %v16_v33, 0.5  ;;  %s270_s16 = sshll.u32 %s345_s2, 4  ;;  %s271_s16 = int_to_ptr.vmem [resolvable:$true] %s270_s16 }
  0x9e   :  { %v86_v46 = vsel %vm84_vm5, %v74_v43, 2102212464  ;;  %v89_v47 = vsel %vm81_vm4, %v68_v41, %v71_v42  ;;  %v93_v48 = vsel %vm81_vm4, %v71_v42, %v74_v43  ;;  %v90_v50 = vsel %vm84_vm5, %v77_v44, 920167782  ;;  %s311_s17 = scalar_lea.vmem %s271_s16, 128  ;;  %p316_p1 = scmp.lt.s32.totalorder %s271_s16, %s271_s16 }
  0x9f   :  { %v94_v51 = vsel %vm84_vm5, %v80_v45, 1326507024  ;;  %v91_v52 = vsel %vm83_vm6, %v74_v43, %v90_v50  ;;  %v85_v55 = vsel %vm81_vm4, %v65_v49, %v68_v41  ;;  %v87_v56 = vsel %vm83_vm6, %v71_v42, %v86_v46  ;;  %p312_p0 = scmp.ne.s32.totalorder %s271_s16, %s311_s17  ;;  %p317_p2 = scmp.lt.s32.totalorder %s311_s17, %s311_s17 }
  0xa0   :  { %v95_v53 = vsel %vm83_vm6, %v77_v44, %v94_v51  ;;  %v92_v57 = vsel %vm82_vm7, %v89_v47, %v91_v52  ;;  %v88_v63 = vsel %vm82_vm7, %v85_v55, %v87_v56  ;;  %v258_v35 = vshrl.u32 %v257_v29, 7 }
  0xa1   :  { %v96_v58 = vsel %vm82_vm7, %v93_v48, %v95_v53  ;;  %v382_v61 = vmul.u32.u64.low %v97_v54, %v92_v57  ;;  %v383_v62 = vmul.u32.u64.high %v97_v54, %v92_v57, %v382_v61  ;;  %v104_v2 = vmul.u32 %v97_v54, %v88_v63  ;;  %p318_p3 = por %p317_p2, %p316_p1 }
  0xa2   :  { %v379_v59 = vmul.u32.u64.low %v97_v54, %v96_v58  ;;  %v380_v60 = vmul.u32.u64.high %v97_v54, %v96_v58, %v379_v59  ;;  %v259_v37 = vsub.s32 0, %v258_v35  ;;  %v256_v39 = vsel %vm17_vm12, 1, %v335_v1 }
  0xa3   :  { %v107_v0 = vadd.s32 1, %v383_v62  ;;  %vm141_vm4 = vweird.f32 %v373_v13  ;;  %p319_p4 = pnand %p318_p3, %p312_p0 }
  0xa4   :  { %vm106_vm8 = vc.u32 %v380_v60, %v382_v61  ;;  %v105_v15 = vadd.s32 %v382_v61, %v380_v60  ;;  %v260_v40 = vrot.slane %v256_v39, %v259_v37 }
  0xa5   :  { %v108_v3 = vsel %vm106_vm8, %v107_v0, %v383_v62 }
  0xa6   :  { %v109_v4 = vadd.s32 %v108_v3, %v104_v2  ;;  %vm261_vm13 = vcmp.eq.s32.totalorder %v260_v40, 1 }
  0xa8   :  { %v110_v5 = vadd.s32 536870912, %v109_v4 }
  0xaa   :  { %v111_v6 = vshrl.u32 %v110_v5, 30 }
  0xac   :  { %v112_v7 = vshll.u32 %v111_v6, 30  ;;  %v135_v28 = vsub.s32 4, %v111_v6 }
  0xae   :  { %v113_v8 = vsub.s32 %v109_v4, %v112_v7  ;;  %v136_v32 = vsel %vm51_vm10, %v135_v28, %v111_v6 }
  0xaf   :  { %v138_v36 = vsel %vm50_vm11, 0, %v136_v32 }
  0xb0   :  { %v115_v9 = vsub.s32 0, %v113_v8  ;;  %v245_v38 = vadd.s32 3, %v138_v36  ;;  %v142_v41 = vand.u32 3, %v138_v36 }
  0xb2   :  { %v280_v10 = vmin.u32 %v115_v9, %v113_v8  ;;  %v246_v42 = vand.u32 3, %v245_v38  ;;  %vm147_vm14 = vcmp.eq.s32.totalorder %v142_v41, 2  ;;  %vm144_vm0 = vcmp.eq.s32.totalorder %v142_v41, 0 }
  0xb3   :  { %vm143_vm2 = vcmp.lt.s32.totalorder %v142_v41, 2 }
  0xb4   :  { %v117_v11 = vclz %v280_v10  ;;  %vm251_vm15 = vcmp.eq.s32.totalorder %v246_v42, 2  ;;  %vm248_vm1 = vcmp.eq.s32.totalorder %v246_v42, 0  ;;  %vm247_vm3 = vcmp.lt.s32.totalorder %v246_v42, 2 }
  0xb6   :  { %v281_v12 = vadd.s32 4294967294, %v117_v11 }
  0xb8   :  { %vm282_vm9 = vcmp.lt.s32.totalorder %v281_v12, 0 }
  0xb9   :  { %v120_v14 = vsel %vm282_vm9, 0, %v281_v12 }
  0xba   :  { %v121_v16 = vsub.s32 32, %v120_v14  ;;  %v125_v17 = vsub.s32 4294967266, %v120_v14  ;;  %v122_v19 = vshll.u32 %v113_v8, %v120_v14 }
  0xbc   :  { %v123_v20 = vshrl.u32 %v105_v15, %v121_v16  ;;  %v126_v21 = vadd.s32 127, %v125_v17 }
  0xbe   :  { %v124_v22 = vor.u32 %v123_v20, %v122_v19  ;;  %v127_v23 = vshll.u32 %v126_v21, 23 }
  0xc0   :  { %v128_v24 = vor.u32 4788187, %v127_v23  ;;  %v131_v26 = vcvt.s32.f32 %v124_v22 }
  0xc2   :  { %v129_v25 = vand.u32 2147483647, %v128_v24 }
  0xc4   :  { %v132_v27 = vmul.f32 %v131_v26, %v129_v25 }
  0xc6   :  { %v133_v30 = vxor.u32 2147483648, %v132_v27 }
  0xc8   :  { %v134_v31 = vsel %vm51_vm10, %v133_v30, %v132_v27 }
  0xc9   :  { %v137_v34 = vsel %vm50_vm11, %v373_v13, %v134_v31 }
  0xca   :  { %307 = vcosq.f32 %v137_v34 }
  0xcb   :  { %309 = vsinq.f32 %v137_v34 }
  0xd4   :  { %v308_v18 = vpop.eup %307 }
  0xd5   :  { %v310_v43 = vpop.eup %309  ;;  %v148_v44 = vxor.u32 2147483648, %v308_v18 }
  0xd6   :  { %v145_v45 = vxor.u32 2147483648, %v310_v43 }
  0xd7   :  { %v149_v46 = vsel %vm147_vm14, %v148_v44, %v310_v43  ;;  %v253_v47 = vsel %vm251_vm15, %v148_v44, %v310_v43 }
  0xd8   :  { %v146_v48 = vsel %vm144_vm0, %v308_v18, %v145_v45  ;;  %v250_v1 = vsel %vm248_vm1, %v308_v18, %v145_v45 }
  0xd9   :  { %v150_v49 = vsel %vm143_vm2, %v146_v48, %v149_v46  ;;  %v254_v50 = vsel %vm247_vm3, %v250_v1, %v253_v47 }
  0xda   :  { %v151_v51 = vsel %vm141_vm4, nan, %v150_v49  ;;  %v255_v52 = vsel %vm141_vm4, nan, %v254_v50 }
  0xdb   :  { %v262_v53 = vsel %vm261_vm13, %v151_v51, %v255_v52 }
  0xdc   :  { %263 = vst [vmem:[#allocation2] sm:$0xff] %v262_v53 }
  0xdd   :  { %322 = shalt.err (!%p319_p4)
}
  0xde   :  { %s323_s20 = scalar_lea.hbm %s414_s3, 128 }
  0xdf   :  { %p324_p5 = scmp.ne.s32.totalorder %s414_s3, %s323_s20  ;;  %p327_p6 = scmp.lt.u32.totalorder %s323_s20, %s414_s3 }
  0xe1   :  { %p329_p7 = pnand %p327_p6, %p324_p5 }
  0xe3   :  { %332 = shalt.err (!%p329_p7)
}
  0xe4   :  { %273 = dma.vmem_to_hbm [thread:$0]  %s271_s16, 128, %s414_s3, [#allocation3]  }
  0xe5   :  { %333 = dma.done.wait [#allocation3], 128  }
  0xe6   :  { %334 = vsyncadd [#allocation3], 4294967168 }
  0xe7   :  { %277 = vsyncpa [#allocation3], 1 }

</bundles_post_ra>
